<compile_context>
chip_gen: v7x
topology: tpu7x:2x2x1
jax: 0.10.0
libtpu: 0.0.40
codegen_flags: <defaults>
</compile_context>

<pallas_src>
import functools
import math

import jax
import jax.numpy as jnp
from jax.experimental import pallas as pl
from jax.experimental.pallas import tpu as pltpu


def _round_up(n, m):
    return ((n + m - 1) // m) * m


# ------------------------------- Pallas kernel -------------------------------

def _pa_kernel(x_ref, w_ref, bias_ref, o_ref, *, W, HWp):
    """Fused depthwise 3x3 conv + bias + sigmoid + gate for one row block.

    Block layouts (per grid step; rows = flattened (batch, channel) pairs):
      x_ref   : (TR, HWp)     spatial axis flattened onto lanes (zero padded)
      w_ref   : (9, TR, HWp)  per-row taps with the zero-padding mask folded in
      bias_ref: (TR, 1)       per-row conv bias
      o_ref   : (TR, HWp)
    """
    x = x_ref[...]                      # stay in the input dtype (f32 here)

    # Center tap (dh=dw=0) seeds the accumulator -- its mask is all-ones.
    acc = x * w_ref[4]

    k = 0
    for dh in (-1, 0, 1):
        for dw in (-1, 0, 1):
            off = dh * W + dw           # flat offset of this tap
            if off != 0:
                # shifted[p] = x[(p + off) mod HWp]; out-of-image / row-wrap
                # positions contribute 0 because the mask is folded into w.
                shifted = pltpu.roll(x, shift=(-off) % HWp, axis=1)
                acc = acc + shifted * w_ref[k]
            k += 1

    y = acc + bias_ref[...]             # (TR, 1) broadcast over lanes

    # sigmoid(y) = 1 / (1 + exp(-y)): exp and the approximate reciprocal both
    # execute on the (otherwise idle) EUP instead of the VALU.
    gate = pl.reciprocal(1.0 + jnp.exp(-y), approx=True)
    o_ref[...] = (x * gate).astype(o_ref.dtype)


# ------------------------------ host-side helpers -----------------------------

def _make_tap_masks(H, W, HWp):
    """(9, HWp) float32 validity masks for the 3x3 taps with padding=1."""
    h = jnp.arange(H)[:, None]
    w = jnp.arange(W)[None, :]
    masks = []
    for dh in (-1, 0, 1):
        for dw in (-1, 0, 1):
            m = ((h + dh >= 0) & (h + dh < H) &
                 (w + dw >= 0) & (w + dw < W)).reshape(-1)
            masks.append(m)
    masks = jnp.stack(masks, axis=0).astype(jnp.float32)       # (9, H*W)
    if HWp > H * W:
        masks = jnp.pad(masks, ((0, 0), (0, HWp - H * W)))     # pad lanes w/ 0
    return masks


def pa_forward(x_nchw, weight, bias):
    """PA forward.  x_nchw: (B, C, H, W); weight: (C, 1, 3, 3); bias: (C,)."""
    B, C, H, W = x_nchw.shape
    HW = H * W
    HWp = _round_up(HW, 128)            # lane-dense stores for any H*W
    R = B * C

    # Row block: multiple of 8 sublanes, capped so x/out/9-tap blocks (double
    # buffered) stay well inside v7x's 64 MiB VMEM at production shapes.
    TR = min(_round_up(R, 8), 64)
    Rp = _round_up(R, TR)

    dtype = x_nchw.dtype
    # (B, C, H, W) -> (B*C, HW): reshape only, NCHW order kept (no transpose).
    x_rows = x_nchw.reshape(R, HW)
    x_rows = jnp.pad(x_rows, ((0, Rp - R), (0, HWp - HW)))

    # Pre-fold the zero-padding masks into per-row taps:
    #   w_comb[k, r, p] = weight[c(r), 0, k//3, k%3] * mask[k, p]
    # (~73 KiB at the test size; for very large C*HW keep the compact (C,9)
    #  taps + (9,HWp) masks form and tile the channel axis instead.)
    masks = _make_tap_masks(H, W, HWp).astype(dtype)                  # (9, HWp)
    taps_rows = jnp.tile(weight.reshape(C, 9).astype(dtype), (B, 1))  # (R, 9)
    taps_rows = jnp.pad(taps_rows, ((0, Rp - R), (0, 0)))             # (Rp, 9)
    w_comb = taps_rows.T[:, :, None] * masks[:, None, :]              # (9, Rp, HWp)

    bias_rows = jnp.tile(bias.astype(dtype), B)                       # (R,)
    bias_rows = jnp.pad(bias_rows, (0, Rp - R)).reshape(Rp, 1)

    grid = (Rp // TR,)
    itemsize = jnp.dtype(dtype).itemsize
    vmem_bytes = 2 * (11 * TR * HWp + TR * 128) * itemsize   # dbl-buffered blocks
    vmem_limit = int(min(max(4 * vmem_bytes, 4 << 20), 48 << 20))

    out = pl.pallas_call(
        functools.partial(_pa_kernel, W=W, HWp=HWp),
        out_shape=jax.ShapeDtypeStruct((Rp, HWp), dtype),
        grid=grid,
        in_specs=[
            pl.BlockSpec((TR, HWp), lambda i: (i, 0)),
            pl.BlockSpec((9, TR, HWp), lambda i: (0, i, 0)),
            pl.BlockSpec((TR, 1), lambda i: (i, 0)),
        ],
        out_specs=pl.BlockSpec((TR, HWp), lambda i: (i, 0)),
        compiler_params=pltpu.CompilerParams(
            dimension_semantics=("parallel",),
            vmem_limit_bytes=vmem_limit),
    )(x_rows, w_comb, bias_rows)

    return out[:R, :HW].reshape(B, C, H, W)


# ------------------------------ pure-JAX reference ----------------------------

def pa_reference(x, weight, bias):
    """Reference PA forward in plain JAX (shifted-window depthwise conv)."""
    B, C, H, W = x.shape
    xp = jnp.pad(x, ((0, 0), (0, 0), (1, 1), (1, 1)))
    acc = jnp.zeros_like(x)
    for dh in range(3):
        for dw in range(3):
            tap = weight[:, 0, dh, dw].reshape(1, C, 1, 1)
            acc = acc + xp[:, :, dh:dh + H, dw:dw + W] * tap
    y = acc + bias.reshape(1, C, 1, 1)
    return x * jax.nn.sigmoid(y)


# ----------------------------------- main -------------------------------------

if __name__ == "__main__":
    key = jax.random.PRNGKey(0)
    kx, kw, kb = jax.random.split(key, 3)

    B, C, H, W = 2, 4, 16, 16                   # dim = 4
    x = jax.random.normal(kx, (B, C, H, W), jnp.float32)

    # Deterministic Conv2d-like init: U(-1/sqrt(fan_in), 1/sqrt(fan_in)),
    # fan_in = (C / groups) * 3 * 3 = 9 for the depthwise conv.
    bound = 1.0 / math.sqrt(9.0)
    weight = jax.random.uniform(kw, (C, 1, 3, 3), jnp.float32, -bound, bound)
    bias = jax.random.uniform(kb, (C,), jnp.float32, -bound, bound)

    out = jax.block_until_ready(pa_forward(x, weight, bias))
    ref = jax.block_until_ready(pa_reference(x, weight, bias))

    assert out.shape == (B, C, H, W), out.shape
    assert bool(jnp.all(jnp.isfinite(out)))
    # Tolerance covers the approximate EUP reciprocal in the sigmoid (~1e-3
    # relative); all other arithmetic is exact f32.
    max_err = float(jnp.max(jnp.abs(out - ref)))
    assert jnp.allclose(out, ref, atol=5e-3, rtol=5e-3), max_err

    print("KERNEL_OK")
</pallas_src>

<mosaic_0001>
module attributes {stable_mosaic.version = 11 : i64} {
  func.func @_pa_kernel(%arg0: i32, %arg1: memref<8x256xf32, #tpu.memory_space<vmem>>, %arg2: memref<9x8x256xf32, #tpu.memory_space<vmem>>, %arg3: memref<8x1xf32, #tpu.memory_space<vmem>>, %arg4: memref<8x256xf32, #tpu.memory_space<vmem>>) attributes {dimension_semantics = [#tpu.dimension_semantics<parallel>], iteration_bounds = array<i64: 1>, scalar_prefetch = 0 : i64, scratch_operands = 0 : i64, tpu.core_type = #tpu.core_type<tc>, window_params = [{transform_indices = @transform_0, window_bounds = array<i64: 8, 256>}, {transform_indices = @transform_1, window_bounds = array<i64: 9, 8, 256>}, {transform_indices = @transform_2, window_bounds = array<i64: 8, 1>}, {transform_indices = @transform_3, window_bounds = array<i64: 8, 256>}]} {
    %c0 = arith.constant 0 : index
    %c0_0 = arith.constant 0 : index
    %0 = vector.load %arg1[%c0, %c0_0] : memref<8x256xf32, #tpu.memory_space<vmem>>, vector<8x256xf32>
    %c4 = arith.constant 4 : index
    %c0_1 = arith.constant 0 : index
    %c0_2 = arith.constant 0 : index
    %1 = vector.load %arg2[%c4, %c0_1, %c0_2] : memref<9x8x256xf32, #tpu.memory_space<vmem>>, vector<1x8x256xf32>
    %2 = vector.shape_cast %1 : vector<1x8x256xf32> to vector<8x256xf32>
    %3 = arith.mulf %0, %2 : vector<8x256xf32>
    %c17_i32 = arith.constant 17 : i32
    %4 = tpu.dynamic_rotate %0 by %c17_i32 dim 1 : vector<8x256xf32>, i32 -> vector<8x256xf32>
    %c0_3 = arith.constant 0 : index
    %c0_4 = arith.constant 0 : index
    %c0_5 = arith.constant 0 : index
    %5 = vector.load %arg2[%c0_3, %c0_4, %c0_5] : memref<9x8x256xf32, #tpu.memory_space<vmem>>, vector<1x8x256xf32>
    %6 = vector.shape_cast %5 : vector<1x8x256xf32> to vector<8x256xf32>
    %7 = arith.mulf %4, %6 : vector<8x256xf32>
    %8 = arith.addf %3, %7 : vector<8x256xf32>
    %c16_i32 = arith.constant 16 : i32
    %9 = tpu.dynamic_rotate %0 by %c16_i32 dim 1 : vector<8x256xf32>, i32 -> vector<8x256xf32>
    %c1 = arith.constant 1 : index
    %c0_6 = arith.constant 0 : index
    %c0_7 = arith.constant 0 : index
    %10 = vector.load %arg2[%c1, %c0_6, %c0_7] : memref<9x8x256xf32, #tpu.memory_space<vmem>>, vector<1x8x256xf32>
    %11 = vector.shape_cast %10 : vector<1x8x256xf32> to vector<8x256xf32>
    %12 = arith.mulf %9, %11 : vector<8x256xf32>
    %13 = arith.addf %8, %12 : vector<8x256xf32>
    %c15_i32 = arith.constant 15 : i32
    %14 = tpu.dynamic_rotate %0 by %c15_i32 dim 1 : vector<8x256xf32>, i32 -> vector<8x256xf32>
    %c2 = arith.constant 2 : index
    %c0_8 = arith.constant 0 : index
    %c0_9 = arith.constant 0 : index
    %15 = vector.load %arg2[%c2, %c0_8, %c0_9] : memref<9x8x256xf32, #tpu.memory_space<vmem>>, vector<1x8x256xf32>
    %16 = vector.shape_cast %15 : vector<1x8x256xf32> to vector<8x256xf32>
    %17 = arith.mulf %14, %16 : vector<8x256xf32>
    %18 = arith.addf %13, %17 : vector<8x256xf32>
    %c1_i32 = arith.constant 1 : i32
    %19 = tpu.dynamic_rotate %0 by %c1_i32 dim 1 : vector<8x256xf32>, i32 -> vector<8x256xf32>
    %c3 = arith.constant 3 : index
    %c0_10 = arith.constant 0 : index
    %c0_11 = arith.constant 0 : index
    %20 = vector.load %arg2[%c3, %c0_10, %c0_11] : memref<9x8x256xf32, #tpu.memory_space<vmem>>, vector<1x8x256xf32>
    %21 = vector.shape_cast %20 : vector<1x8x256xf32> to vector<8x256xf32>
    %22 = arith.mulf %19, %21 : vector<8x256xf32>
    %23 = arith.addf %18, %22 : vector<8x256xf32>
    %c255_i32 = arith.constant 255 : i32
    %24 = tpu.dynamic_rotate %0 by %c255_i32 dim 1 : vector<8x256xf32>, i32 -> vector<8x256xf32>
    %c5 = arith.constant 5 : index
    %c0_12 = arith.constant 0 : index
    %c0_13 = arith.constant 0 : index
    %25 = vector.load %arg2[%c5, %c0_12, %c0_13] : memref<9x8x256xf32, #tpu.memory_space<vmem>>, vector<1x8x256xf32>
    %26 = vector.shape_cast %25 : vector<1x8x256xf32> to vector<8x256xf32>
    %27 = arith.mulf %24, %26 : vector<8x256xf32>
    %28 = arith.addf %23, %27 : vector<8x256xf32>
    %c241_i32 = arith.constant 241 : i32
    %29 = tpu.dynamic_rotate %0 by %c241_i32 dim 1 : vector<8x256xf32>, i32 -> vector<8x256xf32>
    %c6 = arith.constant 6 : index
    %c0_14 = arith.constant 0 : index
    %c0_15 = arith.constant 0 : index
    %30 = vector.load %arg2[%c6, %c0_14, %c0_15] : memref<9x8x256xf32, #tpu.memory_space<vmem>>, vector<1x8x256xf32>
    %31 = vector.shape_cast %30 : vector<1x8x256xf32> to vector<8x256xf32>
    %32 = arith.mulf %29, %31 : vector<8x256xf32>
    %33 = arith.addf %28, %32 : vector<8x256xf32>
    %c240_i32 = arith.constant 240 : i32
    %34 = tpu.dynamic_rotate %0 by %c240_i32 dim 1 : vector<8x256xf32>, i32 -> vector<8x256xf32>
    %c7 = arith.constant 7 : index
    %c0_16 = arith.constant 0 : index
    %c0_17 = arith.constant 0 : index
    %35 = vector.load %arg2[%c7, %c0_16, %c0_17] : memref<9x8x256xf32, #tpu.memory_space<vmem>>, vector<1x8x256xf32>
    %36 = vector.shape_cast %35 : vector<1x8x256xf32> to vector<8x256xf32>
    %37 = arith.mulf %34, %36 : vector<8x256xf32>
    %38 = arith.addf %33, %37 : vector<8x256xf32>
    %c239_i32 = arith.constant 239 : i32
    %39 = tpu.dynamic_rotate %0 by %c239_i32 dim 1 : vector<8x256xf32>, i32 -> vector<8x256xf32>
    %c8 = arith.constant 8 : index
    %c0_18 = arith.constant 0 : index
    %c0_19 = arith.constant 0 : index
    %40 = vector.load %arg2[%c8, %c0_18, %c0_19] : memref<9x8x256xf32, #tpu.memory_space<vmem>>, vector<1x8x256xf32>
    %41 = vector.shape_cast %40 : vector<1x8x256xf32> to vector<8x256xf32>
    %42 = arith.mulf %39, %41 : vector<8x256xf32>
    %43 = arith.addf %38, %42 : vector<8x256xf32>
    %c0_20 = arith.constant 0 : index
    %c0_21 = arith.constant 0 : index
    %44 = vector.load %arg3[%c0_20, %c0_21] : memref<8x1xf32, #tpu.memory_space<vmem>>, vector<8x1xf32>
    %45 = vector.broadcast %44 : vector<8x1xf32> to vector<8x256xf32>
    %46 = arith.addf %43, %45 : vector<8x256xf32>
    %cst = arith.constant 0.000000e+00 : f32
    %47 = vector.broadcast %cst : f32 to vector<8x256xf32>
    %48 = arith.subf %47, %46 : vector<8x256xf32>
    %49 = math.exp %48 : vector<8x256xf32>
    %cst_22 = arith.constant 1.000000e+00 : f32
    %50 = vector.broadcast %cst_22 : f32 to vector<8x256xf32>
    %51 = arith.addf %50, %49 : vector<8x256xf32>
    %52 = tpu.reciprocal %51 {approx = true} : vector<8x256xf32> -> vector<8x256xf32>
    %53 = arith.mulf %0, %52 : vector<8x256xf32>
    %c0_23 = arith.constant 0 : index
    %c0_24 = arith.constant 0 : index
    %54 = vector.load %arg4[%c0_23, %c0_24] : memref<8x256xf32, #tpu.memory_space<vmem>>, vector<8x256xf32>
    tpu.vector_store %arg4[%c0_23, %c0_24], %53 {strides = array<i32>} : memref<8x256xf32, #tpu.memory_space<vmem>>, vector<8x256xf32>,
    return
  }
  func.func @transform_0(%arg0: i32) -> (i32, i32) {
    %c0_i32 = arith.constant 0 : i32
    %c0_i32_0 = arith.constant 0 : i32
    return %arg0, %c0_i32 : i32, i32
  }
  func.func @transform_1(%arg0: i32) -> (i32, i32, i32) {
    %c0_i32 = arith.constant 0 : i32
    %c0_i32_0 = arith.constant 0 : i32
    %c0_i32_1 = arith.constant 0 : i32
    return %c0_i32, %arg0, %c0_i32_0 : i32, i32, i32
  }
  func.func @transform_2(%arg0: i32) -> (i32, i32) {
    %c0_i32 = arith.constant 0 : i32
    %c0_i32_0 = arith.constant 0 : i32
    return %arg0, %c0_i32 : i32, i32
  }
  func.func @transform_3(%arg0: i32) -> (i32, i32) {
    %c0_i32 = arith.constant 0 : i32
    %c0_i32_0 = arith.constant 0 : i32
    return %arg0, %c0_i32 : i32, i32
  }
}

</mosaic_0001>

<bundles_post_ra>
// kernel: tpu_custom_call.1
= control target key start
LH: loop header
LB: loop body
LE: loop exit
PB: predicated region body
PF: predicated region fallthrough
CT: control target
= control target key end

     0   :  { %8 = vsyncpa [#allocation3], 0  ;;  %s414_s0 = inlined_call_operand.hbm [shape: f32[8,256], index: 0, kind: input, shape index: {}]   ;;  %s415_s1 = inlined_call_operand.hbm [shape: f32[9,8,256], index: 1, kind: input, shape index: {}]   ;;  %s416_s2 = inlined_call_operand.vmem [shape: f32[8,1], index: 2, kind: input, shape index: {}]   ;;  %s417_s3 = inlined_call_operand.hbm [shape: f32[8,256], index: 3, kind: output, shape index: {}]  }
   0x1   :  { %9 = vsyncpa [#allocation6], 0 }
   0x2   :  { %10 = vsyncpa [#allocation4], 0  ;;  %s293_s12 = smov [#allocation2]   ;;  %s294_s14 = smov [#allocation5]  }
   0x3   :  { %s17_s13 = sshll.u32 %s293_s12, 4  ;;  %s26_s15 = sshll.u32 %s294_s14, 4  ;;  %s18_s13 = int_to_ptr.vmem [resolvable:$true] %s17_s13  ;;  %s326_s15 = int_to_ptr.vmem [resolvable:$true] %s26_s15 }
   0x4   :  { %s221_s18 = scalar_lea.hbm %s414_s0, 256 }
   0x5   :  { %p222_p0 = scmp.ne.s32.totalorder %s414_s0, %s221_s18  ;;  %p225_p1 = scmp.lt.u32.totalorder %s221_s18, %s414_s0 }
   0x7   :  { %p227_p2 = pnand %p225_p1, %p222_p0 }
   0x9   :  { %230 = shalt.err (!%p227_p2)
}
   0xa   :  { %s231_s23 = scalar_lea.vmem %s18_s13, 256  ;;  %p236_p4 = scmp.lt.s32.totalorder %s18_s13, %s18_s13 }
   0xb   :  { %p232_p3 = scmp.ne.s32.totalorder %s18_s13, %s231_s23  ;;  %p237_p5 = scmp.lt.s32.totalorder %s231_s23, %s231_s23 }
   0xd   :  { %p238_p6 = por %p237_p5, %p236_p4 }
   0xf   :  { %p239_p7 = pnand %p238_p6, %p232_p3 }
  0x11   :  { %242 = shalt.err (!%p239_p7)
}
  0x12   :  { %20 = dma.hbm_to_vmem [thread:$0]  %s414_s0, 256, %s18_s13, [#allocation3]  }
  0x13   :  { %s243_s28 = scalar_lea.hbm %s415_s1, 2304 }
  0x14   :  { %p244_p8 = scmp.ne.s32.totalorder %s415_s1, %s243_s28  ;;  %p247_p9 = scmp.lt.u32.totalorder %s243_s28, %s415_s1 }
  0x16   :  { %p249_p10 = pnand %p247_p9, %p244_p8 }
  0x18   :  { %252 = shalt.err (!%p249_p10)
}
  0x19   :  { %s253_s6 = scalar_lea.vmem %s326_s15, 2304  ;;  %p258_p12 = scmp.lt.s32.totalorder %s326_s15, %s326_s15 }
  0x1a   :  { %p254_p11 = scmp.ne.s32.totalorder %s326_s15, %s253_s6  ;;  %p259_p13 = scmp.lt.s32.totalorder %s253_s6, %s253_s6 }
  0x1c   :  { %p260_p0 = por %p259_p13, %p258_p12 }
  0x1e   :  { %p261_p1 = pnand %p260_p0, %p254_p11 }
  0x20   :  { %264 = shalt.err (!%p261_p1)
}
  0x21   :  { %s295_s0 = smov 256   ;;  %s296_s7 = smov 16  }
  0x22   :  { %32 = dma.hbm_to_vmem [thread:$0]  %s415_s1, 2304, %s326_s15, [#allocation6], %s295_s0, %s295_s0, %s296_s7  }
  0x23   :  { %287 = dma.done.wait [#allocation3], 256  }
  0x24   :  { %288 = vsyncadd [#allocation3], 4294967040 }
  0x25   :  { %289 = dma.done.wait [#allocation6], 2304  }
  0x26   :  { %290 = vsyncadd [#allocation6], 4294964992  ;;  %v297_v0 = vmov 0   ;;  %v357_v1 = vld [vmem:[#allocation2] sm:$0xff]  ;;  %s298_s10 = smov 17   ;;  %v361_v2 = vld [vmem:[#allocation2 + $0x8] sm:$0xff]  ;;  %v52_v6 = vlaneseq }
  0x27   :  { %212 = vset.pattern.permute.xlu0 %v297_v0  ;;  %63 = vrot.lane.b32.xlu1 %v357_v1, %s296_s7  ;;  %s299_s1 = smov 15   ;;  %s300_s11 = smov 1   ;;  %v161_v3 = vld [vmem:[%s416_s2] sm:$0xff]  ;;  %v44_v14 = vld [vmem:[#allocation5 + $0x40] sm:$0xff]  ;;  %v45_v15 = vld [vmem:[#allocation5 + $0x48] sm:$0xff] }
  0x28   :  { %48 = vrot.lane.b32.xlu0 %v357_v1, %s298_s10  ;;  %s301_s12 = smov 127   ;;  %s302_s13 = smov 113   ;;  %v380_v9 = vand.u32 127, %v52_v6  ;;  %v57_v16 = vld [vmem:[#allocation5] sm:$0xff]  ;;  %v58_v17 = vld [vmem:[#allocation5 + $0x8] sm:$0xff]  ;;  %v47_v22 = vmul.f32 %v45_v15, %v361_v2  ;;  %v46_v23 = vmul.f32 %v44_v14, %v357_v1  ;;  %v71_v27 = vld [vmem:[#allocation5 + $0x10] sm:$0xff] }
  0x29   :  { %s303_s14 = smov 112   ;;  %s304_s17 = smov 111   ;;  %v72_v28 = vld [vmem:[#allocation5 + $0x18] sm:$0xff]  ;;  %v85_v34 = vld [vmem:[#allocation5 + $0x20] sm:$0xff]  ;;  %v86_v35 = vld [vmem:[#allocation5 + $0x28] sm:$0xff] }
  0x2a   :  { %vm54_vm0 = vcmp.lt.s32.totalorder %v380_v9, 17  ;;  %vm67_vm1 = vcmp.lt.s32.totalorder %v380_v9, 16  ;;  %vm81_vm2 = vcmp.lt.s32.totalorder %v380_v9, 15  ;;  %vm95_vm3 = vcmp.lt.s32.totalorder %v380_v9, 1  ;;  %v99_v41 = vld [vmem:[#allocation5 + $0x30] sm:$0xff]  ;;  %v100_v42 = vld [vmem:[#allocation5 + $0x38] sm:$0xff] }
  0x2b   :  { %65 = vrot.lane.b32.xlu1 %v361_v2, %s296_s7  ;;  %vm109_vm4 = vcmp.lt.s32.totalorder %v380_v9, 127  ;;  %vm123_vm5 = vcmp.lt.s32.totalorder %v380_v9, 113  ;;  %v113_v49 = vld [vmem:[#allocation5 + $0x50] sm:$0xff]  ;;  %v114_v50 = vld [vmem:[#allocation5 + $0x58] sm:$0xff]  ;;  %vm137_vm6 = vcmp.lt.s32.totalorder %v380_v9, 112  ;;  %v127_v57 = vld [vmem:[#allocation5 + $0x60] sm:$0xff] }
  0x2c   :  { %50 = vrot.lane.b32.xlu0 %v361_v2, %s298_s10  ;;  %v128_v58 = vld [vmem:[#allocation5 + $0x68] sm:$0xff]  ;;  %vm151_vm7 = vcmp.lt.s32.totalorder %v380_v9, 111  ;;  %s305_s2 = smov [#allocation7]  }
  0x2d   :  { %v156_v14 = vld [vmem:[#allocation5 + $0x88] sm:$0xff]  ;;  %s189_s18 = sshll.u32 %s305_s2, 4  ;;  %s190_s18 = int_to_ptr.vmem [resolvable:$true] %s189_s18 }
  0x2e   :  { %s265_s19 = scalar_lea.vmem %s190_s18, 256  ;;  %p270_p3 = scmp.lt.s32.totalorder %s190_s18, %s190_s18 }
  0x2f   :  { %79 = vrot.lane.b32.xlu1 %v361_v2, %s299_s1  ;;  %p266_p2 = scmp.ne.s32.totalorder %s190_s18, %s265_s19  ;;  %p271_p4 = scmp.lt.s32.totalorder %s265_s19, %s265_s19 }
  0x30   :  { %77 = vrot.lane.b32.xlu0 %v357_v1, %s299_s1 }
  0x31   :  { %p272_p5 = por %p271_p4, %p270_p3 }
  0x33   :  { %93 = vrot.lane.b32.xlu1 %v361_v2, %s300_s11  ;;  %p273_p6 = pnand %p272_p5, %p266_p2 }
  0x34   :  { %91 = vrot.lane.b32.xlu0 %v357_v1, %s300_s11 }
  0x37   :  { %107 = vrot.lane.b32.xlu1 %v361_v2, %s301_s12 }
  0x38   :  { %105 = vrot.lane.b32.xlu0 %v357_v1, %s301_s12 }
  0x3b   :  { %121 = vrot.lane.b32.xlu1 %v361_v2, %s302_s13 }
  0x3c   :  { %119 = vrot.lane.b32.xlu0 %v357_v1, %s302_s13 }
  0x3f   :  { %135 = vrot.lane.b32.xlu1 %v361_v2, %s303_s14 }
  0x40   :  { %133 = vrot.lane.b32.xlu0 %v357_v1, %s303_s14 }
  0x43   :  { %147 = vrot.lane.b32.xlu1 %v357_v1, %s304_s17 }
  0x44   :  { %164 = vperm.xlu0 %212, %v161_v3   ;;  %v141_v3 = vld [vmem:[#allocation5 + $0x70] sm:$0xff] }
  0x47   :  { %149 = vrot.lane.b32.xlu1 %v361_v2, %s304_s17 }
  0x99   :  { %v64_v4 = vpop.permute.xlu1 %63 }
  0x9a   :  { %v49_v5 = vpop.permute.xlu0 %48 }
  0x9d   :  { %v66_v7 = vpop.permute.xlu1 %65 }
  0x9e   :  { %v51_v8 = vpop.permute.xlu0 %50  ;;  %v68_v29 = vsel %vm67_vm1, %v64_v4, %v66_v7  ;;  %v69_v30 = vsel %vm67_vm1, %v66_v7, %v64_v4  ;;  %v142_v4 = vld [vmem:[#allocation5 + $0x78] sm:$0xff] }
  0x9f   :  { %v55_v18 = vsel %vm54_vm0, %v49_v5, %v51_v8  ;;  %v56_v19 = vsel %vm54_vm0, %v51_v8, %v49_v5  ;;  %v73_v38 = vmul.f32 %v71_v27, %v69_v30  ;;  %v74_v39 = vmul.f32 %v72_v28, %v68_v29 }
  0xa0   :  { %v59_v24 = vmul.f32 %v57_v16, %v56_v19  ;;  %v60_v25 = vmul.f32 %v58_v17, %v55_v18 }
  0xa1   :  { %v80_v10 = vpop.permute.xlu1 %79 }
  0xa2   :  { %v78_v11 = vpop.permute.xlu0 %77  ;;  %v61_v31 = vadd.f32 %v59_v24, %v46_v23  ;;  %v62_v32 = vadd.f32 %v60_v25, %v47_v22 }
  0xa3   :  { %v82_v36 = vsel %vm81_vm2, %v78_v11, %v80_v10  ;;  %v83_v37 = vsel %vm81_vm2, %v80_v10, %v78_v11 }
  0xa4   :  { %v76_v45 = vadd.f32 %v74_v39, %v62_v32  ;;  %v75_v46 = vadd.f32 %v73_v38, %v61_v31  ;;  %v87_v47 = vmul.f32 %v85_v34, %v83_v37  ;;  %v88_v48 = vmul.f32 %v86_v35, %v82_v36 }
  0xa5   :  { %v94_v12 = vpop.permute.xlu1 %93 }
  0xa6   :  { %v92_v13 = vpop.permute.xlu0 %91  ;;  %v89_v61 = vadd.f32 %v87_v47, %v75_v46  ;;  %v90_v62 = vadd.f32 %v88_v48, %v76_v45 }
  0xa7   :  { %v96_v43 = vsel %vm95_vm3, %v92_v13, %v94_v12  ;;  %v97_v44 = vsel %vm95_vm3, %v94_v12, %v92_v13  ;;  %v155_v13 = vld [vmem:[#allocation5 + $0x80] sm:$0xff] }
  0xa8   :  { %v101_v53 = vmul.f32 %v99_v41, %v97_v44  ;;  %v102_v54 = vmul.f32 %v100_v42, %v96_v43 }
  0xa9   :  { %v108_v20 = vpop.permute.xlu1 %107 }
  0xaa   :  { %v106_v21 = vpop.permute.xlu0 %105  ;;  %v103_v7 = vadd.f32 %v101_v53, %v89_v61  ;;  %v104_v8 = vadd.f32 %v102_v54, %v90_v62 }
  0xab   :  { %v110_v51 = vsel %vm109_vm4, %v106_v21, %v108_v20  ;;  %v111_v52 = vsel %vm109_vm4, %v108_v20, %v106_v21 }
  0xac   :  { %v115_v63 = vmul.f32 %v113_v49, %v110_v51  ;;  %v116_v0 = vmul.f32 %v114_v50, %v111_v52 }
  0xad   :  { %v122_v26 = vpop.permute.xlu1 %121 }
  0xae   :  { %v120_v33 = vpop.permute.xlu0 %119  ;;  %v117_v17 = vadd.f32 %v115_v63, %v103_v7  ;;  %v118_v18 = vadd.f32 %v116_v0, %v104_v8 }
  0xaf   :  { %v124_v59 = vsel %vm123_vm5, %v120_v33, %v122_v26  ;;  %v125_v60 = vsel %vm123_vm5, %v122_v26, %v120_v33 }
  0xb0   :  { %v129_v10 = vmul.f32 %v127_v57, %v124_v59  ;;  %v130_v11 = vmul.f32 %v128_v58, %v125_v60 }
  0xb1   :  { %v136_v40 = vpop.permute.xlu1 %135 }
  0xb2   :  { %v134_v55 = vpop.permute.xlu0 %133  ;;  %v131_v21 = vadd.f32 %v129_v10, %v117_v17  ;;  %v132_v22 = vadd.f32 %v130_v11, %v118_v18 }
  0xb3   :  { %v138_v5 = vsel %vm137_vm6, %v134_v55, %v136_v40  ;;  %v139_v6 = vsel %vm137_vm6, %v136_v40, %v134_v55 }
  0xb4   :  { %v143_v19 = vmul.f32 %v141_v3, %v138_v5  ;;  %v144_v20 = vmul.f32 %v142_v4, %v139_v6 }
  0xb5   :  { %v148_v56 = vpop.permute.xlu1 %147 }
  0xb6   :  { %v146_v25 = vadd.f32 %v144_v20, %v132_v22  ;;  %v145_v26 = vadd.f32 %v143_v19, %v131_v21 }
  0xb9   :  { %v150_v12 = vpop.permute.xlu1 %149 }
  0xba   :  { %v152_v15 = vsel %vm151_vm7, %v148_v56, %v150_v12  ;;  %v153_v16 = vsel %vm151_vm7, %v150_v12, %v148_v56 }
  0xbb   :  { %v157_v23 = vmul.f32 %v155_v13, %v152_v15  ;;  %v158_v24 = vmul.f32 %v156_v14, %v153_v16 }
  0xbd   :  { %v160_v27 = vadd.f32 %v158_v24, %v146_v25  ;;  %v159_v28 = vadd.f32 %v157_v23, %v145_v26 }
  0xc3   :  { %v165_v29 = vpop.permute.xlu0 %164 }
  0xc4   :  { %v167_v30 = vadd.f32 %v165_v29, %v159_v28  ;;  %v168_v31 = vadd.f32 %v165_v29, %v160_v27 }
  0xc6   :  { %v169_v32 = vsub.f32 0.0, %v167_v30  ;;  %v170_v33 = vsub.f32 0.0, %v168_v31 }
  0xc8   :  { %v171_v34 = vmul.f32 1.442695, %v169_v32  ;;  %v173_v9 = vmul.f32 1.442695, %v170_v33 }
  0xca   :  { %213 = vpow2.f32 %v171_v34 }
  0xcb   :  { %215 = vpow2.f32 %v173_v9 }
  0xd4   :  { %v214_v35 = vpop.eup %213 }
  0xd5   :  { %v216_v36 = vpop.eup %215  ;;  %v175_v37 = vadd.f32 1.0, %v214_v35 }
  0xd6   :  { %v176_v38 = vadd.f32 1.0, %v216_v36 }
  0xd7   :  { %217 = vrcp.f32 %v175_v37 }
  0xd8   :  { %219 = vrcp.f32 %v176_v38 }
  0xe1   :  { %v218_v39 = vpop.eup %217 }
  0xe2   :  { %v220_v40 = vpop.eup %219  ;;  %v179_v41 = vmul.f32 %v218_v39, %v357_v1 }
  0xe3   :  { %v180_v42 = vmul.f32 %v220_v40, %v361_v2 }
  0xe4   :  { %181 = vst [vmem:[#allocation7] sm:$0xff] %v179_v41 }
  0xe5   :  { %182 = vst [vmem:[#allocation7 + $0x8] sm:$0xff] %v180_v42 }
  0xe6   :  { %276 = shalt.err (!%p273_p6)
}
  0xe7   :  { %s277_s22 = scalar_lea.hbm %s417_s3, 256 }
  0xe8   :  { %p278_p7 = scmp.ne.s32.totalorder %s417_s3, %s277_s22  ;;  %p281_p8 = scmp.lt.u32.totalorder %s277_s22, %s417_s3 }
  0xea   :  { %p283_p9 = pnand %p281_p8, %p278_p7 }
  0xec   :  { %286 = shalt.err (!%p283_p9)
}
  0xed   :  { %192 = dma.vmem_to_hbm [thread:$0]  %s190_s18, 256, %s417_s3, [#allocation4]  }
  0xee   :  { %291 = dma.done.wait [#allocation4], 256  }
  0xef   :  { %292 = vsyncadd [#allocation4], 4294967040 }
  0xf0   :  { %196 = vsyncpa [#allocation3], 1 }
  0xf1   :  { %197 = vsyncpa [#allocation6], 1 }
  0xf2   :  { %198 = vsyncpa [#allocation4], 1 }

</bundles_post_ra>
